<compile_context>
chip_gen: v5e
topology: v5e:2x2
jax: 0.10.0
libtpu: 0.0.40
codegen_flags: <defaults>
</compile_context>

<pallas_src>
import functools

import jax
import jax.numpy as jnp
from jax import lax
from jax.experimental import pallas as pl
from jax.experimental.pallas import tpu as pltpu

LANE = 128
SUBLANE = 8


def _round_up(x, m):
    return (x + m - 1) // m * m


def _pad_axis(a, axis, new_size):
    pad = new_size - a.shape[axis]
    if pad == 0:
        return a
    widths = [(0, 0)] * a.ndim
    widths[axis] = (0, pad)
    return jnp.pad(a, widths)


def _choose_tile(n, tm):
    """Effective batch tile: multiple of 8, and (when the batch allows it) an even
    number of >= 2 grid steps so the 'parallel' batch axis splits evenly across
    both v7x TensorCores."""
    tm = max(SUBLANE, min(tm, _round_up(n, SUBLANE)))
    num = -(-n // tm)
    if n > SUBLANE and num % 2 == 1:
        num += 1
        tm = max(SUBLANE, _round_up(-(-n // num), SUBLANE))
    return tm


def _pack_params(blocks):
    """Pack a list of (name, 2-D array) into a single f32 slab.

    Each block starts on an 8-aligned row (so in-kernel static slices stay on
    sublane-tile boundaries) and is zero padded to the slab lane width.
    Returns (slab, layout) with layout[name] = (row_offset, rows, cols)."""
    width = _round_up(max(int(a.shape[1]) for _, a in blocks), LANE)
    rows, layout, off = [], {}, 0
    for name, a in blocks:
        a = jnp.asarray(a, jnp.float32)
        r, c = int(a.shape[0]), int(a.shape[1])
        r_pad = _round_up(r, SUBLANE)
        layout[name] = (off, r, c)
        rows.append(jnp.pad(a, ((0, r_pad - r), (0, width - c))))
        off += r_pad
    return jnp.concatenate(rows, axis=0), layout


def vqvae_trans_kernel(x_ref, p_ref, out_ref, stats_ref,
                       *, n_valid, tm, code_pad, layout):
    f32 = jnp.float32

    def P(name):
        r0, nr, nc = layout[name]
        return p_ref[r0:r0 + nr, 0:nc]          # static, 8-row-aligned slice of the slab

    # ---------------- EncoderTrans: x -> 48 -> 96 -> latent ----------------
    x = x_ref[...]
    h = jnp.maximum(jnp.dot(x, P("w1e"), preferred_element_type=f32) + P("b1e"), 0.0)
    h = jnp.maximum(jnp.dot(h, P("w2e"), preferred_element_type=f32) + P("b2e"), 0.0)
    z_e = jnp.dot(h, P("w3e"), preferred_element_type=f32) + P("b3e")       # (tm, latent)

    # ---------------- nearest-codebook quantization ----------------
    # argmin_k |z - c_k|^2 == argmin_k (|c_k|^2 - 2 z.c_k)   (per-row |z|^2 dropped)
    dist = P("cbsq") - 2.0 * jnp.dot(z_e, P("cbt"), preferred_element_type=f32)  # (tm, code_pad)

    # first-occurrence argmin: min value, then min index among ties
    lane_iota = lax.broadcasted_iota(jnp.int32, (tm, code_pad), 1)
    min_d = jnp.min(dist, axis=-1, keepdims=True)                           # (tm, 1)
    cand = jnp.where(dist <= min_d, lane_iota, code_pad)
    idx = jnp.min(cand, axis=-1, keepdims=True)                             # (tm, 1)
    onehot = (lane_iota == idx).astype(f32)                                 # (tm, code_pad)

    # straight-through forward value: z_q = codebook[idx]  (one-hot matmul on the MXU)
    z_q = jnp.dot(onehot, P("cb"), preferred_element_type=f32)              # (tm, latent)

    # rows past the true batch size are zero padding -> lane-oriented valid mask,
    # statistics computed as (1, tm) @ (tm, ...) MXU matmuls
    row = pl.program_id(0) * tm + lax.broadcasted_iota(jnp.int32, (1, tm), 1)
    valid_row = (row < n_valid).astype(f32)                                 # (1, tm)

    counts = jnp.dot(valid_row, onehot, preferred_element_type=f32)         # (1, code_pad)
    diff2 = (z_e - z_q) ** 2                                                # (tm, latent)
    sq_row = jnp.dot(valid_row, diff2, preferred_element_type=f32)          # (1, latent)
    sq = jnp.sum(sq_row, axis=-1, keepdims=True)                            # (1, 1)

    # merged per-tile stats block: [counts | sqerr broadcast]  (lane offsets 0 and code_pad,
    # both multiples of 128 -> aligned stores)
    stats_ref[:, :, 0:code_pad] = counts.reshape(1, 1, code_pad)
    stats_ref[:, :, code_pad:code_pad + LANE] = jnp.broadcast_to(sq, (1, 1, LANE))

    # ---------------- DecoderTrans: z_q -> 48 -> 96 -> nfeats (narrow slab) ----------------
    h = jnp.maximum(jnp.dot(z_q, P("w1d"), preferred_element_type=f32) + P("b1d"), 0.0)
    h = jnp.maximum(jnp.dot(h, P("w2d"), preferred_element_type=f32) + P("b2d"), 0.0)
    out_ref[...] = (jnp.dot(h, P("w3d"), preferred_element_type=f32)
                    + P("b3d")).astype(out_ref.dtype)


def vqvae_trans_forward(features, params, *, tm=1024):
    """features: [N, nfeats] float32. Returns (x_out, loss, perplexity) like VQVAE_Trans.forward."""
    N, nfeats = features.shape
    enc, dec, cb = params["enc"], params["dec"], params["codebook"]
    latent = enc["w3"].shape[1]
    code_num, code_dim = cb.shape
    assert code_dim == latent

    in_pad = _round_up(nfeats, SUBLANE)        # tidy contraction dim for the first matmul
    out_pad = _round_up(nfeats, SUBLANE)       # narrow output slab; block covers the full last dim
    code_pad = _round_up(code_num, LANE)

    tm_eff = _choose_tile(N, tm)
    n_pad = _round_up(N, tm_eff)
    num_tiles = n_pad // tm_eff

    # pad activations (zero padding is an exact no-op for the math; stats rows are masked)
    x_p = _pad_axis(_pad_axis(features.astype(jnp.float32), 1, in_pad), 0, n_pad)

    # codebook in both orientations + |c|^2 (padded codes get 1e30 so they never win)
    cb_p = _pad_axis(cb, 0, code_pad)                                   # (code_pad, latent)
    cbsq = jnp.sum(cb_p * cb_p, axis=1)[None, :]                        # (1, code_pad)
    if code_pad != code_num:
        cbsq = jnp.where((jnp.arange(code_pad) >= code_num)[None, :], 1e30, cbsq)

    # single packed parameter slab (weights pre-transposed as (in, out): every layer is x @ W + b)
    slab, layout = _pack_params([
        ("w1e", _pad_axis(enc["w1"], 0, in_pad)), ("b1e", enc["b1"][None, :]),
        ("w2e", enc["w2"]), ("b2e", enc["b2"][None, :]),
        ("w3e", enc["w3"]), ("b3e", enc["b3"][None, :]),
        ("cbt", cb_p.T), ("cbsq", cbsq), ("cb", cb_p),
        ("w1d", dec["w1"]), ("b1d", dec["b1"][None, :]),
        ("w2d", dec["w2"]), ("b2d", dec["b2"][None, :]),
        ("w3d", _pad_axis(dec["w3"], 1, out_pad)),
        ("b3d", _pad_axis(dec["b3"], 0, out_pad)[None, :]),
    ])

    kernel = functools.partial(vqvae_trans_kernel, n_valid=N, tm=tm_eff,
                               code_pad=code_pad, layout=layout)

    stats_w = code_pad + LANE
    vmem_limit = (16 if tm_eff <= 1024 else 32) * 1024 * 1024

    out, stats = pl.pallas_call(
        kernel,
        out_shape=(
            jax.ShapeDtypeStruct((n_pad, out_pad), jnp.float32),
            jax.ShapeDtypeStruct((num_tiles, 1, stats_w), jnp.float32),
        ),
        grid_spec=pltpu.PrefetchScalarGridSpec(
            num_scalar_prefetch=0,
            grid=(num_tiles,),
            in_specs=[
                pl.BlockSpec((tm_eff, in_pad), lambda i: (i, 0)),       # x tile
                pl.BlockSpec(slab.shape, lambda i: (0, 0)),             # resident packed params
            ],
            out_specs=(
                pl.BlockSpec((tm_eff, out_pad), lambda i: (i, 0)),      # decoded output tile
                pl.BlockSpec((1, 1, stats_w), lambda i: (i, 0, 0)),     # per-tile [counts | sqerr]
            ),
        ),
        compiler_params=pltpu.CompilerParams(
            dimension_semantics=("parallel",),
            vmem_limit_bytes=vmem_limit,
        ),
    )(x_p, slab)

    x_out = out[:N, :nfeats]

    # finalize quantizer statistics (tiny reductions, plain JAX)
    counts = jnp.sum(stats[:, 0, :code_num], axis=0)                    # (code_num,)
    probs = counts / jnp.float32(N)
    perplexity = jnp.exp(-jnp.sum(probs * jnp.log(probs + 1e-10)))
    loss = jnp.sum(stats[:, 0, code_pad]) / jnp.float32(N * latent)     # commitment MSE
    return x_out, loss, perplexity


def init_vqvae_params(key, nfeats=9, latent_dim=16, code_num=256):
    """Synthetic deterministic init mirroring nn.Linear shapes.
    PyTorch stores W as (out, in); we store the transpose (in, out)."""
    scale = 3
    h1, h2 = 16 * scale, 32 * scale          # 48, 96
    ks = jax.random.split(key, 13)

    def lin(kw, kb, fin, fout):
        bound = 1.0 / jnp.sqrt(fin)
        w = jax.random.uniform(kw, (fin, fout), jnp.float32, -bound, bound)
        b = jax.random.uniform(kb, (fout,), jnp.float32, -bound, bound)
        return w, b

    enc = {}
    enc["w1"], enc["b1"] = lin(ks[0], ks[1], nfeats, h1)
    enc["w2"], enc["b2"] = lin(ks[2], ks[3], h1, h2)
    enc["w3"], enc["b3"] = lin(ks[4], ks[5], h2, latent_dim)
    dec = {}
    dec["w1"], dec["b1"] = lin(ks[6], ks[7], latent_dim, h1)
    dec["w2"], dec["b2"] = lin(ks[8], ks[9], h1, h2)
    dec["w3"], dec["b3"] = lin(ks[10], ks[11], h2, nfeats)
    codebook = jax.random.normal(ks[12], (code_num, latent_dim), jnp.float32)
    return {"enc": enc, "dec": dec, "codebook": codebook}


def vqvae_trans_ref(features, params):
    """Pure-JAX reference of the same forward pass."""
    enc, dec, cb = params["enc"], params["dec"], params["codebook"]
    hp = lax.Precision.HIGHEST

    def mlp(v, p):
        v = jnp.maximum(jnp.dot(v, p["w1"], precision=hp) + p["b1"], 0.0)
        v = jnp.maximum(jnp.dot(v, p["w2"], precision=hp) + p["b2"], 0.0)
        return jnp.dot(v, p["w3"], precision=hp) + p["b3"]

    z_e = mlp(features, enc)
    d = (jnp.sum(z_e ** 2, axis=1, keepdims=True)
         - 2.0 * jnp.dot(z_e, cb.T, precision=hp)
         + jnp.sum(cb ** 2, axis=1)[None, :])
    idx = jnp.argmin(d, axis=1)
    z_q = cb[idx]
    counts = jnp.sum(jax.nn.one_hot(idx, cb.shape[0], dtype=jnp.float32), axis=0)
    probs = counts / features.shape[0]
    perplexity = jnp.exp(-jnp.sum(probs * jnp.log(probs + 1e-10)))
    loss = jnp.mean((z_e - z_q) ** 2)
    x_out = mlp(z_q, dec)
    return x_out, loss, perplexity


if __name__ == "__main__":
    key = jax.random.PRNGKey(0)
    k_param, k_x = jax.random.split(key)

    nfeats, latent_dim, code_num, batch = 9, 16, 256, 20
    params = init_vqvae_params(k_param, nfeats=nfeats, latent_dim=latent_dim, code_num=code_num)
    x = jax.random.normal(k_x, (batch, nfeats), jnp.float32)

    x_out, loss, perplexity = vqvae_trans_forward(x, params, tm=1024)
    x_out = jax.block_until_ready(x_out)

    x_ref, loss_ref, ppl_ref = vqvae_trans_ref(x, params)
    assert x_out.shape == (batch, nfeats)
    assert jnp.allclose(x_out, x_ref, atol=2e-4, rtol=2e-4), "x_out mismatch vs reference"
    assert jnp.allclose(loss, loss_ref, atol=2e-4, rtol=2e-4), "loss mismatch vs reference"
    assert jnp.allclose(perplexity, ppl_ref, atol=2e-3, rtol=2e-3), "perplexity mismatch vs reference"

    print("KERNEL_OK")
</pallas_src>

<mosaic_0001>
module attributes {stable_mosaic.version = 11 : i64} {
  func.func @vqvae_trans_kernel(%arg0: i32, %arg1: memref<16x16xf32, #tpu.memory_space<vmem>>, %arg2: memref<648x256xf32, #tpu.memory_space<vmem>>, %arg3: memref<16x16xf32, #tpu.memory_space<vmem>>, %arg4: memref<1x1x384xf32, #tpu.memory_space<vmem>>) attributes {dimension_semantics = [#tpu.dimension_semantics<parallel>], iteration_bounds = array<i64: 2>, scalar_prefetch = 0 : i64, scratch_operands = 0 : i64, tpu.core_type = #tpu.core_type<tc>, window_params = [{transform_indices = @transform_0, window_bounds = array<i64: 16, 16>}, {pipeline_mode = #tpu.pipeline_mode<synchronous>, transform_indices = @transform_1, window_bounds = array<i64: 648, 256>}, {transform_indices = @transform_2, window_bounds = array<i64: 16, 16>}, {transform_indices = @transform_3, window_bounds = array<i64: 1, 1, 384>}]} {
    %c0 = arith.constant 0 : index
    %c0_0 = arith.constant 0 : index
    %0 = vector.load %arg1[%c0, %c0_0] : memref<16x16xf32, #tpu.memory_space<vmem>>, vector<16x16xf32>
    %c0_1 = arith.constant 0 : index
    %c0_2 = arith.constant 0 : index
    %1 = vector.load %arg2[%c0_1, %c0_2] : memref<648x256xf32, #tpu.memory_space<vmem>>, vector<16x48xf32>
    %cst = arith.constant dense<0.000000e+00> : vector<16x48xf32>
    %2 = tpu.matmul %0, %1, %cst {dimension_numbers = #tpu.dot_dimension_numbers<[1], [0], [0], [1], [0, 0, 1, 1], [], []>} : vector<16x16xf32>, vector<16x48xf32>, vector<16x48xf32> -> vector<16x48xf32>
    %c16 = arith.constant 16 : index
    %c0_3 = arith.constant 0 : index
    %3 = vector.load %arg2[%c16, %c0_3] : memref<648x256xf32, #tpu.memory_space<vmem>>, vector<1x48xf32>
    %4 = vector.broadcast %3 : vector<1x48xf32> to vector<16x48xf32>
    %5 = arith.addf %2, %4 : vector<16x48xf32>
    %cst_4 = arith.constant 0.000000e+00 : f32
    %6 = vector.broadcast %cst_4 : f32 to vector<16x48xf32>
    %7 = arith.maximumf %5, %6 : vector<16x48xf32>
    %c24 = arith.constant 24 : index
    %c0_5 = arith.constant 0 : index
    %8 = vector.load %arg2[%c24, %c0_5] : memref<648x256xf32, #tpu.memory_space<vmem>>, vector<48x96xf32>
    %cst_6 = arith.constant dense<0.000000e+00> : vector<16x96xf32>
    %9 = tpu.matmul %7, %8, %cst_6 {dimension_numbers = #tpu.dot_dimension_numbers<[1], [0], [0], [1], [0, 0, 1, 1], [], []>} : vector<16x48xf32>, vector<48x96xf32>, vector<16x96xf32> -> vector<16x96xf32>
    %c72 = arith.constant 72 : index
    %c0_7 = arith.constant 0 : index
    %10 = vector.load %arg2[%c72, %c0_7] : memref<648x256xf32, #tpu.memory_space<vmem>>, vector<1x96xf32>
    %11 = vector.broadcast %10 : vector<1x96xf32> to vector<16x96xf32>
    %12 = arith.addf %9, %11 : vector<16x96xf32>
    %cst_8 = arith.constant 0.000000e+00 : f32
    %13 = vector.broadcast %cst_8 : f32 to vector<16x96xf32>
    %14 = arith.maximumf %12, %13 : vector<16x96xf32>
    %c80 = arith.constant 80 : index
    %c0_9 = arith.constant 0 : index
    %15 = vector.load %arg2[%c80, %c0_9] : memref<648x256xf32, #tpu.memory_space<vmem>>, vector<96x16xf32>
    %cst_10 = arith.constant dense<0.000000e+00> : vector<16x16xf32>
    %16 = tpu.matmul %14, %15, %cst_10 {dimension_numbers = #tpu.dot_dimension_numbers<[1], [0], [0], [1], [0, 0, 1, 1], [], []>} : vector<16x96xf32>, vector<96x16xf32>, vector<16x16xf32> -> vector<16x16xf32>
    %c176 = arith.constant 176 : index
    %c0_11 = arith.constant 0 : index
    %17 = vector.load %arg2[%c176, %c0_11] : memref<648x256xf32, #tpu.memory_space<vmem>>, vector<1x16xf32>
    %18 = vector.broadcast %17 : vector<1x16xf32> to vector<16x16xf32>
    %19 = arith.addf %16, %18 : vector<16x16xf32>
    %c200 = arith.constant 200 : index
    %c0_12 = arith.constant 0 : index
    %20 = vector.load %arg2[%c200, %c0_12] : memref<648x256xf32, #tpu.memory_space<vmem>>, vector<1x256xf32>
    %c184 = arith.constant 184 : index
    %c0_13 = arith.constant 0 : index
    %21 = vector.load %arg2[%c184, %c0_13] : memref<648x256xf32, #tpu.memory_space<vmem>>, vector<16x256xf32>
    %cst_14 = arith.constant dense<0.000000e+00> : vector<16x256xf32>
    %22 = tpu.matmul %19, %21, %cst_14 {dimension_numbers = #tpu.dot_dimension_numbers<[1], [0], [0], [1], [0, 0, 1, 1], [], []>} : vector<16x16xf32>, vector<16x256xf32>, vector<16x256xf32> -> vector<16x256xf32>
    %cst_15 = arith.constant 2.000000e+00 : f32
    %23 = vector.broadcast %cst_15 : f32 to vector<16x256xf32>
    %24 = arith.mulf %23, %22 : vector<16x256xf32>
    %25 = vector.broadcast %20 : vector<1x256xf32> to vector<16x256xf32>
    %26 = arith.subf %25, %24 : vector<16x256xf32>
    %27 = tpu.iota {dimensions = array<i32: 1>} : vector<16x256xi32>
    %cst_16 = arith.constant dense<0x7F800000> : vector<16xf32>
    %28 = vector.multi_reduction <minimumf>, %26, %cst_16 [1] : vector<16x256xf32> to vector<16xf32>
    %29 = vector.shape_cast %28 : vector<16xf32> to vector<16x1xf32>
    %30 = vector.broadcast %29 : vector<16x1xf32> to vector<16x256xf32>
    %31 = arith.cmpf ole, %26, %30 : vector<16x256xf32>
    %c256_i32 = arith.constant 256 : i32
    %32 = vector.broadcast %c256_i32 : i32 to vector<16x256xi32>
    %33 = arith.select %31, %27, %32 : vector<16x256xi1>, vector<16x256xi32>
    %cst_17 = arith.constant dense<2147483647> : vector<16xi32>
    %34 = vector.multi_reduction <minsi>, %33, %cst_17 [1] : vector<16x256xi32> to vector<16xi32>
    %35 = vector.shape_cast %34 : vector<16xi32> to vector<16x1xi32>
    %36 = vector.broadcast %35 : vector<16x1xi32> to vector<16x256xi32>
    %37 = arith.cmpi eq, %27, %36 : vector<16x256xi32>
    %38 = arith.extui %37 : vector<16x256xi1> to vector<16x256xi32>
    %39 = arith.sitofp %38 : vector<16x256xi32> to vector<16x256xf32>
    %c208 = arith.constant 208 : index
    %c0_18 = arith.constant 0 : index
    %40 = vector.load %arg2[%c208, %c0_18] : memref<648x256xf32, #tpu.memory_space<vmem>>, vector<256x16xf32>
    %cst_19 = arith.constant dense<0.000000e+00> : vector<16x16xf32>
    %41 = tpu.matmul %39, %40, %cst_19 {dimension_numbers = #tpu.dot_dimension_numbers<[1], [0], [0], [1], [0, 0, 1, 1], [], []>} : vector<16x256xf32>, vector<256x16xf32>, vector<16x16xf32> -> vector<16x16xf32>
    %c16_i32 = arith.constant 16 : i32
    %42 = arith.muli %arg0, %c16_i32 : i32
    %43 = tpu.iota {dimensions = array<i32: 1>} : vector<1x16xi32>
    %44 = vector.broadcast %42 : i32 to vector<1x16xi32>
    %45 = arith.addi %44, %43 : vector<1x16xi32>
    %c20_i32 = arith.constant 20 : i32
    %46 = vector.broadcast %c20_i32 : i32 to vector<1x16xi32>
    %47 = arith.cmpi slt, %45, %46 : vector<1x16xi32>
    %48 = arith.extui %47 : vector<1x16xi1> to vector<1x16xi32>
    %49 = arith.sitofp %48 : vector<1x16xi32> to vector<1x16xf32>
    %cst_20 = arith.constant dense<0.000000e+00> : vector<1x256xf32>
    %50 = tpu.matmul %49, %39, %cst_20 {dimension_numbers = #tpu.dot_dimension_numbers<[1], [0], [0], [1], [0, 0, 1, 1], [], []>} : vector<1x16xf32>, vector<16x256xf32>, vector<1x256xf32> -> vector<1x256xf32>
    %51 = arith.subf %19, %41 : vector<16x16xf32>
    %52 = arith.mulf %51, %51 : vector<16x16xf32>
    %cst_21 = arith.constant dense<0.000000e+00> : vector<1x16xf32>
    %53 = tpu.matmul %49, %52, %cst_21 {dimension_numbers = #tpu.dot_dimension_numbers<[1], [0], [0], [1], [0, 0, 1, 1], [], []>} : vector<1x16xf32>, vector<16x16xf32>, vector<1x16xf32> -> vector<1x16xf32>
    %cst_22 = arith.constant dense<0.000000e+00> : vector<1xf32>
    %54 = vector.multi_reduction <add>, %53, %cst_22 [1] : vector<1x16xf32> to vector<1xf32>
    %55 = vector.shape_cast %54 : vector<1xf32> to vector<1x1xf32>
    %56 = vector.shape_cast %50 : vector<1x256xf32> to vector<1x1x256xf32>
    %c0_23 = arith.constant 0 : index
    %c0_24 = arith.constant 0 : index
    %c0_25 = arith.constant 0 : index
    %57 = vector.load %arg4[%c0_23, %c0_24, %c0_25] : memref<1x1x384xf32, #tpu.memory_space<vmem>>, vector<1x1x256xf32>
    tpu.vector_store %arg4[%c0_23, %c0_24, %c0_25], %56 {strides = array<i32>} : memref<1x1x384xf32, #tpu.memory_space<vmem>>, vector<1x1x256xf32>,
    %58 = vector.shape_cast %55 : vector<1x1xf32> to vector<1x1x1xf32>
    %59 = vector.broadcast %58 : vector<1x1x1xf32> to vector<1x1x128xf32>
    %c0_26 = arith.constant 0 : index
    %c0_27 = arith.constant 0 : index
    %c256 = arith.constant 256 : index
    %60 = vector.load %arg4[%c0_26, %c0_27, %c256] : memref<1x1x384xf32, #tpu.memory_space<vmem>>, vector<1x1x128xf32>
    tpu.vector_store %arg4[%c0_26, %c0_27, %c256], %59 {strides = array<i32>} : memref<1x1x384xf32, #tpu.memory_space<vmem>>, vector<1x1x128xf32>,
    %c464 = arith.constant 464 : index
    %c0_28 = arith.constant 0 : index
    %61 = vector.load %arg2[%c464, %c0_28] : memref<648x256xf32, #tpu.memory_space<vmem>>, vector<16x48xf32>
    %cst_29 = arith.constant dense<0.000000e+00> : vector<16x48xf32>
    %62 = tpu.matmul %41, %61, %cst_29 {dimension_numbers = #tpu.dot_dimension_numbers<[1], [0], [0], [1], [0, 0, 1, 1], [], []>} : vector<16x16xf32>, vector<16x48xf32>, vector<16x48xf32> -> vector<16x48xf32>
    %c480 = arith.constant 480 : index
    %c0_30 = arith.constant 0 : index
    %63 = vector.load %arg2[%c480, %c0_30] : memref<648x256xf32, #tpu.memory_space<vmem>>, vector<1x48xf32>
    %64 = vector.broadcast %63 : vector<1x48xf32> to vector<16x48xf32>
    %65 = arith.addf %62, %64 : vector<16x48xf32>
    %cst_31 = arith.constant 0.000000e+00 : f32
    %66 = vector.broadcast %cst_31 : f32 to vector<16x48xf32>
    %67 = arith.maximumf %65, %66 : vector<16x48xf32>
    %c488 = arith.constant 488 : index
    %c0_32 = arith.constant 0 : index
    %68 = vector.load %arg2[%c488, %c0_32] : memref<648x256xf32, #tpu.memory_space<vmem>>, vector<48x96xf32>
    %cst_33 = arith.constant dense<0.000000e+00> : vector<16x96xf32>
    %69 = tpu.matmul %67, %68, %cst_33 {dimension_numbers = #tpu.dot_dimension_numbers<[1], [0], [0], [1], [0, 0, 1, 1], [], []>} : vector<16x48xf32>, vector<48x96xf32>, vector<16x96xf32> -> vector<16x96xf32>
    %c536 = arith.constant 536 : index
    %c0_34 = arith.constant 0 : index
    %70 = vector.load %arg2[%c536, %c0_34] : memref<648x256xf32, #tpu.memory_space<vmem>>, vector<1x96xf32>
    %71 = vector.broadcast %70 : vector<1x96xf32> to vector<16x96xf32>
    %72 = arith.addf %69, %71 : vector<16x96xf32>
    %cst_35 = arith.constant 0.000000e+00 : f32
    %73 = vector.broadcast %cst_35 : f32 to vector<16x96xf32>
    %74 = arith.maximumf %72, %73 : vector<16x96xf32>
    %c544 = arith.constant 544 : index
    %c0_36 = arith.constant 0 : index
    %75 = vector.load %arg2[%c544, %c0_36] : memref<648x256xf32, #tpu.memory_space<vmem>>, vector<96x16xf32>
    %cst_37 = arith.constant dense<0.000000e+00> : vector<16x16xf32>
    %76 = tpu.matmul %74, %75, %cst_37 {dimension_numbers = #tpu.dot_dimension_numbers<[1], [0], [0], [1], [0, 0, 1, 1], [], []>} : vector<16x96xf32>, vector<96x16xf32>, vector<16x16xf32> -> vector<16x16xf32>
    %c640 = arith.constant 640 : index
    %c0_38 = arith.constant 0 : index
    %77 = vector.load %arg2[%c640, %c0_38] : memref<648x256xf32, #tpu.memory_space<vmem>>, vector<1x16xf32>
    %78 = vector.broadcast %77 : vector<1x16xf32> to vector<16x16xf32>
    %79 = arith.addf %76, %78 : vector<16x16xf32>
    %c0_39 = arith.constant 0 : index
    %c0_40 = arith.constant 0 : index
    %80 = vector.load %arg3[%c0_39, %c0_40] : memref<16x16xf32, #tpu.memory_space<vmem>>, vector<16x16xf32>
    tpu.vector_store %arg3[%c0_39, %c0_40], %79 {strides = array<i32>} : memref<16x16xf32, #tpu.memory_space<vmem>>, vector<16x16xf32>,
    return
  }
  func.func @transform_0(%arg0: i32) -> (i32, i32) {
    %c0_i32 = arith.constant 0 : i32
    %c0_i32_0 = arith.constant 0 : i32
    return %arg0, %c0_i32 : i32, i32
  }
  func.func @transform_1(%arg0: i32) -> (i32, i32) {
    %c0_i32 = arith.constant 0 : i32
    %c0_i32_0 = arith.constant 0 : i32
    %c0_i32_1 = arith.constant 0 : i32
    return %c0_i32, %c0_i32_0 : i32, i32
  }
  func.func @transform_2(%arg0: i32) -> (i32, i32) {
    %c0_i32 = arith.constant 0 : i32
    %c0_i32_0 = arith.constant 0 : i32
    return %arg0, %c0_i32 : i32, i32
  }
  func.func @transform_3(%arg0: i32) -> (i32, i32, i32) {
    %c0_i32 = arith.constant 0 : i32
    %c0_i32_0 = arith.constant 0 : i32
    %c0_i32_1 = arith.constant 0 : i32
    return %arg0, %c0_i32, %c0_i32_0 : i32, i32, i32
  }
}

</mosaic_0001>

<bundles_post_ra>
// kernel: tpu_custom_call.1
= control target key start
LH: loop header
LB: loop body
LE: loop exit
PB: predicated region body
PF: predicated region fallthrough
CT: control target
= control target key end

     0   :  { %9 = vsyncpa [#allocation3], 0  ;;  %s1261_s0 = inlined_call_operand.vmem [shape: f32[32,16], index: 0, kind: input, shape index: {}]   ;;  %s1262_s1 = inlined_call_operand.hbm [shape: f32[648,256], index: 1, kind: input, shape index: {}]   ;;  %s1263_s2 = inlined_call_operand.vmem [shape: f32[32,16], index: 2, kind: output, shape index: {0}]   ;;  %s1264_s3 = inlined_call_operand.hbm [shape: f32[2,1,384], index: 3, kind: output, shape index: {1}]  }
   0x1   :  { %10 = vsyncpa [#allocation4], 0 }
   0x2   :  { %12 = vsyncpa [#allocation4 + $0x1], 0  ;;  %s1083_s12 = smov 0   ;;  %s1085_s13 = smov 0  }
   0x3   :  { %s1087_s14 = smov 0   ;;  %s1089_s15 = smov 0  }
   0x4 LB: > { %s1104_s16 = sadd.s32 4294967295, %s1056_s15   ;;  %s859_s17 = sadd.s32 4294967294, %s1056_s15   ;;  %s1056_s15 = sphi %s1089_s15, %s1270_s15   ;;  %s1052_s14 = sphi %s1087_s14, %s1269_s14   ;;  %s1048_s13 = sphi %s1085_s13, %s1268_s13   ;;  %s1044_s12 = sphi %s1083_s12, %s1267_s12  }
   0x5   : > { %s1108_s18 = sadd.s32 1, %s1056_s15   ;;  %s98_s19 = sadd.s32 1, %s1052_s14 }
   0x6   : > { %s95_s20 = ssub.s32 %s1056_s15, %s1108_s18  ;;  %p108_p0 = scmp.ne.s32.totalorder %s1052_s14, %s1048_s13 }
   0x7   : > { %p96_p1 = scmp.eq.s32.totalorder %s95_s20, 0  ;;  %p109_p2 = scmp.eq.s32.totalorder %s1104_s16, 1 }
   0x8   : > { %p114_p3 = scmp.ne.s32.totalorder %s1048_s13, %s1044_s12  ;;  %p115_p4 = scmp.eq.s32.totalorder %s859_s17, 1 }
   0x9   : > { %s1119_s21 = scalar_select %p96_p1, %s1052_s14, %s98_s19  }
   0xa   : > { %p1121_p5 = por %p109_p2, %p108_p0  ;;  %p1125_p6 = por %p115_p4, %p114_p3 }
   0xb   : > { %p860_p7 = scmp.ge.s32.totalorder %s1056_s15, 1  ;;  %p122_p8 = scmp.lt.s32.totalorder %s1056_s15, 3 }
   0xc   : > { %p920_p9 = scmp.eq.s32.totalorder %s1104_s16, 0  ;;  %s133_s26 = sshll.u32 %s1262_s1, 4  ;;  %s134_s26 = int_to_ptr.hbm [resolvable:$true] %s133_s26 }
   0xd   : > { %p123_p10 = pnand %p860_p7, %p122_p8  ;;  %s1058_s27 = smov [#allocation2]  }
   0xe   : > { %s135_s28 = sshll.u32 %s1058_s27, 4  ;;  %s1059_s29 = smov 256   ;;  %s136_s28 = int_to_ptr.vmem [resolvable:$true] %s135_s28 }
   0xf   : > { %p912_p11 = pneg %p123_p10  ;;  %s1060_s30 = smov 16  }
  0x10   : > { %160 = sbr.rel (%p123_p10) target bundleno = 1467 (0x5bb), region = 28 }
  0x11   : > { %p913_p12 = pnand %p920_p9, %p912_p11 }
  0x13   : > { %915 = dma.hbm_to_vmem [thread:$0]  (!%p913_p12), %s134_s26, 20736, %s136_s28, [#allocation3], %s1059_s29, %s1059_s29, %s1060_s30  }
  0x15   : > { %1035 = dma.done.wait (%p920_p9), [#allocation3], 20736  }
  0x16   : > { %1037 = vsyncadd (%p920_p9), [#allocation3], 4294946560  ;;  %s865_s4 = sshll.u32 %s1104_s16, 1  ;;  %v205_v0 = vld [vmem:[#allocation2 + $0x10] sm:$0xff]  ;;  %v204_v1 = vld [vmem:[#allocation2] sm:$0xff]  ;;  %vm207_vm0 = vcmask 130048   ;;  %v392_v62 = vlaneseq }
  0x17   : > { %p191_p13 = scmp.lt.s32.totalorder %s865_s4, 3  ;;  %228 = vmatpush.msra.mxu1 %v205_v0  ;;  %v244_v3 = vld [vmem:[#allocation2 + $0x80] sm:$0xff]  ;;  %v243_v4 = vld [vmem:[#allocation2 + $0x70] sm:$0xff]  ;;  %vm246_vm1 = vcmask 392192   ;;  %vm291_vm2 = vcmask 785408   ;;  %v326_v37 = vld [vmem:[#allocation2 + $0x188] sm:$0xff] }
  0x18   : > { %v242_v5 = vld [vmem:[#allocation2 + $0x60] sm:$0xff]  ;;  %v241_v6 = vld [vmem:[#allocation2 + $0x50] sm:$0xff]  ;;  %370 = vmatpush.msra.mxu0 %v326_v37  ;;  %v324_v39 = vld [vmem:[#allocation2 + $0x178] sm:$0xff]  ;;  %v1169_v63 = vand.u32 127, %v392_v62  ;;  %s887_s9 = sshll.u32 %s1104_s16, 4  ;;  %s187_s10 = sand.u32 1, %s1048_s13  }
  0x19   : > { %s1272_s4 = smov (!%p191_p13, %s865_s4), 3  ;;  %229 = vmatpush.msra.mxu1 %v204_v1  ;;  %v240_v8 = vld [vmem:[#allocation2 + $0x40] sm:$0xff]  ;;  %v239_v9 = vld [vmem:[#allocation2 + $0x30] sm:$0xff]  ;;  %s904_s11 = smul.u32 3, %s187_s10 }
  0x1a   : > { %s866_s5 = sshll.u32 %s1272_s4, 3  ;;  %v289_v10 = vld [vmem:[#allocation2 + $0x150] sm:$0xff]  ;;  %v288_v11 = vld [vmem:[#allocation2 + $0x140] sm:$0xff]  ;;  %371 = vmatpush.msra.mxu0 %v324_v39  ;;  %v1172_v0 = vadd.s32 128, %v1169_v63  ;;  %s905_s19 = smul.u32 3, %s1104_s16 }
  0x1b   : > { %s194_s8 = scalar_lea.vmem %s1261_s0, %s866_s5  ;;  %263 = vmatpush.msrb.mxu1 %v244_v3  ;;  %302 = vmatpush.msra.mxu2 %v289_v10  ;;  %v287_v12 = vld [vmem:[#allocation2 + $0x130] sm:$0xff]  ;;  %v286_v13 = vld [vmem:[#allocation2 + $0x120] sm:$0xff]  ;;  %s1211_s17 = scalar_lea.vmem [#allocation5], %s904_s11 }
  0x1c   : > { %v202_v2 = vld [vmem:[%s194_s8] sm:$0xff]  ;;  %v203_v7 = vld [vmem:[%s194_s8 + $0x8] sm:$0xff]  ;;  %v285_v14 = vld [vmem:[#allocation2 + $0x110] sm:$0xff]  ;;  %s758_s25 = scalar_lea.hbm %s1264_s3, %s905_s19  ;;  %s760_s26 = sshll.u32 %s1211_s17, 4  ;;  %s761_s26 = int_to_ptr.vmem [resolvable:$true] %s760_s26 }
  0x1d   : > { %869 = vmatmul.msk.f32.vlgmr.msra.gmra.mxu1 %vm207_vm0, %v202_v2  ;;  %303 = vmatpush.msra.mxu2 %v288_v11  ;;  %v284_v15 = vld [vmem:[#allocation2 + $0x100] sm:$0xff]  ;;  %v283_v16 = vld [vmem:[#allocation2 + $0xf0] sm:$0xff]  ;;  %s762_s27 = sshll.u32 %s758_s25, 4  ;;  %s744_s28 = scalar_lea.sflag [#allocation4], %s187_s10  ;;  %s763_s27 = int_to_ptr.hbm [resolvable:$true] %s762_s27 }
  0x1e   : > { %264 = vmatpush.msrb.mxu1 %v243_v4  ;;  %v282_v17 = vld [vmem:[#allocation2 + $0xe0] sm:$0xff]  ;;  %v281_v18 = vld [vmem:[#allocation2 + $0xd0] sm:$0xff]  ;;  %s1004_s29 = sshra.s32 %s763_s27, 4  ;;  %s1010_s7 = scalar_lea.hbm %s1264_s3, 6  ;;  %s1005_s29 = int_to_ptr.hbm [resolvable:$true] %s1004_s29 }
  0x1f   : > { %304 = vmatpush.msra.mxu2 %v287_v12  ;;  %v206_v19 = vld [vmem:[#allocation2 + $0x20] ss:$0 sm:$0xff]  ;;  %v279_v27 = vld [vmem:[#allocation2 + $0xb0] sm:$0xff]  ;;  %s1006_s30 = scalar_lea.hbm %s1005_s29, 3  ;;  %p1011_p3 = scmp.lt.s32.totalorder %s1005_s29, %s1264_s3 }
  0x20   : > { %265 = vmatpush.msrb.mxu1 %v242_v5  ;;  %v280_v26 = vld [vmem:[#allocation2 + $0xc0] sm:$0xff]  ;;  %v245_v29 = vld [vmem:[#allocation2 + $0x90] ss:$0 sm:$0xff]  ;;  %p1007_p0 = scmp.ne.s32.totalorder %s1005_s29, %s1006_s30  ;;  %p1012_p4 = scmp.lt.s32.totalorder %s1010_s7, %s1006_s30 }
  0x21   : > { %305 = vmatpush.msra.mxu2 %v286_v13  ;;  %v278_v28 = vld [vmem:[#allocation2 + $0xa0] sm:$0xff]  ;;  %v323_v38 = vld [vmem:[#allocation2 + $0x170] sm:$0xff] }
  0x22   : > { %266 = vmatpush.msrb.mxu1 %v241_v6  ;;  %v325_v36 = vld [vmem:[#allocation2 + $0x180] sm:$0xff]  ;;  %v322_v46 = vld [vmem:[#allocation2 + $0x190] ss:$8 sm:$0x3]  ;;  %p1008_p1 = pnand %p1007_p0, %p1121_p5  ;;  %p1013_p7 = por %p1012_p4, %p1011_p3 }
  0x23   : > { %306 = vmatpush.msra.mxu2 %v285_v14  ;;  %347 = vmatpush.msra.mxu3 %v325_v36  ;;  %v290_v40 = vld [vmem:[#allocation2 + $0x160] ss:$0 sm:$0xff]  ;;  %v385_v48 = vperm.slane %v322_v46, 1  ;;  %v384_v49 = vperm.slane %v322_v46, 0  ;;  %v468_v13 = vld [vmem:[#allocation2 + $0x290] sm:$0xff] }
  0x24   : > { %267 = vmatpush.msrb.mxu1 %v240_v8  ;;  %v484_v14 = vld [vmem:[#allocation2 + $0x390] sm:$0xff]  ;;  %v457_v36 = vld [vmem:[#allocation2 + $0x1e0] sm:$0xff]  ;;  %p1009_p2 = pneg %p1008_p1 }
  0x25   : > { %870 = vmatmul.msk.f32.gmra.mxu1 %vm207_vm0, %v203_v7  ;;  %307 = vmatpush.msra.mxu2 %v284_v15  ;;  %v467_v15 = vld [vmem:[#allocation2 + $0x280] sm:$0xff] }
  0x26   : > { %268 = vmatpush.msrb.mxu1 %v239_v9  ;;  %348 = vmatpush.msra.mxu3 %v323_v38  ;;  %v473_v37 = vld [vmem:[#allocation2 + $0x2e0] sm:$0xff]  ;;  %p1014_p8 = pnand %p1013_p7, %p1009_p2 }
  0x27   : > { %308 = vmatpush.msra.mxu2 %v283_v16  ;;  %v483_v16 = vld [vmem:[#allocation2 + $0x380] sm:$0xff] }
  0x28   : > { %485 = vmatpush.msrb.mxu3 %v468_v13  ;;  %508 = vmatpush.msra.mxu1 %v484_v14 }
  0x29   : > { %309 = vmatpush.msra.mxu2 %v282_v17  ;;  %v466_v17 = vld [vmem:[#allocation2 + $0x270] sm:$0xff] }
  0x2a   : > { %486 = vmatpush.msrb.mxu3 %v467_v15  ;;  %509 = vmatpush.msra.mxu1 %v483_v16 }
  0x2b   : > { %310 = vmatpush.msra.mxu2 %v281_v18  ;;  %v482_v18 = vld [vmem:[#allocation2 + $0x370] sm:$0xff] }
  0x2c   : > { %487 = vmatpush.msrb.mxu3 %v466_v17  ;;  %510 = vmatpush.msra.mxu1 %v482_v18 }
  0x2d   : > { %311 = vmatpush.msra.mxu2 %v280_v26  ;;  %v478_v26 = vld [vmem:[#allocation2 + $0x330] sm:$0xff] }
  0x2f   : > { %312 = vmatpush.msra.mxu2 %v279_v27  ;;  %v461_v27 = vld [vmem:[#allocation2 + $0x220] sm:$0xff] }
  0x31   : > { %313 = vmatpush.msra.mxu2 %v278_v28  ;;  %v477_v28 = vld [vmem:[#allocation2 + $0x320] sm:$0xff] }
  0x9a   : > { %v231_v20 = vpop.f32.mrf.mxu1 }
  0x9b   : > { %v232_v21 = vadd.f32 %v231_v20, %v206_v19  ;;  %v481_v20 = vld [vmem:[#allocation2 + $0x360] sm:$0xff] }
  0x9c   : > { %511 = vmatpush.msra.mxu1 %v481_v20  ;;  %v660_v20 = vld [vmem:[#allocation2 + $0x410] sm:$0xff] }
  0x9d   : > { %v237_v22 = vmax.f32 %v232_v21, 0.0  ;;  %v464_v21 = vld [vmem:[#allocation2 + $0x250] sm:$0xff] }
  0x9f   : > { %871 = vmatmul.msk.f32.vlgmr.msrb.gmra.mxu1 %vm246_vm1, %v237_v22  ;;  %v480_v22 = vld [vmem:[#allocation2 + $0x350] sm:$0xff] }
  0xa0   : > { %512 = vmatpush.msra.mxu1 %v480_v22  ;;  %v658_v22 = vld [vmem:[#allocation2 + $0x3f0] sm:$0xff] }
  0xa2   : > { %v234_v23 = vpop.f32.mrf.mxu1 }
  0xa3   : > { %v235_v24 = vadd.f32 %v234_v23, %v206_v19  ;;  %v465_v19 = vld [vmem:[#allocation2 + $0x260] sm:$0xff] }
  0xa4   : > { %488 = vmatpush.msrb.mxu3 %v465_v19  ;;  %v463_v23 = vld [vmem:[#allocation2 + $0x240] sm:$0xff] }
  0xa5   : > { %v238_v25 = vmax.f32 %v235_v24, 0.0  ;;  %v479_v24 = vld [vmem:[#allocation2 + $0x340] sm:$0xff] }
  0xa6   : > { %489 = vmatpush.msrb.mxu3 %v464_v21  ;;  %513 = vmatpush.msra.mxu1 %v479_v24  ;;  %v659_v21 = vld [vmem:[#allocation2 + $0x400] sm:$0xff] }
  0xa7   : > { %872 = vmatmul.msk.f32.gmra.mxu1 %vm246_vm1, %v238_v25  ;;  %v462_v25 = vld [vmem:[#allocation2 + $0x230] sm:$0xff] }
  0xa8   : > { %490 = vmatpush.msrb.mxu3 %v463_v23  ;;  %514 = vmatpush.msra.mxu1 %v478_v26  ;;  %v656_v26 = vld [vmem:[#allocation2 + $0x3d0] sm:$0xff] }
  0xaa   : > { %491 = vmatpush.msrb.mxu3 %v462_v25  ;;  %515 = vmatpush.msra.mxu1 %v477_v28  ;;  %v657_v25 = vld [vmem:[#allocation2 + $0x3e0] sm:$0xff] }
  0xab   : > { %v704_v28 = vld [vmem:[#allocation2 + $0x4e0] sm:$0xff] }
  0xac   : > { %492 = vmatpush.msrb.mxu3 %v461_v27  ;;  %v705_v27 = vld [vmem:[#allocation2 + $0x4f0] sm:$0xff] }
 0x11c   : > { %v270_v30 = vpop.f32.mrf.mxu1 }
 0x11d   : > { %v271_v31 = vadd.f32 %v270_v30, %v245_v29  ;;  %v476_v30 = vld [vmem:[#allocation2 + $0x310] sm:$0xff] }
 0x11e   : > { %516 = vmatpush.msra.mxu1 %v476_v30  ;;  %v702_v30 = vld [vmem:[#allocation2 + $0x4c0] sm:$0xff] }
 0x11f   : > { %v276_v32 = vmax.f32 %v271_v31, 0.0  ;;  %v459_v31 = vld [vmem:[#allocation2 + $0x200] sm:$0xff] }
 0x121   : > { %873 = vmatmul.msk.f32.vlgmr.msra.gmra.mxu2 %vm291_vm2, %v276_v32  ;;  %v475_v32 = vld [vmem:[#allocation2 + $0x300] sm:$0xff] }
 0x122   : > { %517 = vmatpush.msra.mxu1 %v475_v32  ;;  %v700_v32 = vld [vmem:[#allocation2 + $0x4a0] sm:$0xff] }
 0x124   : > { %v273_v33 = vpop.f32.mrf.mxu1 }
 0x125   : > { %v274_v34 = vadd.f32 %v273_v33, %v245_v29  ;;  %v460_v29 = vld [vmem:[#allocation2 + $0x210] sm:$0xff] }
 0x126   : > { %493 = vmatpush.msrb.mxu3 %v460_v29  ;;  %v703_v29 = vld [vmem:[#allocation2 + $0x4d0] sm:$0xff] }
 0x127   : > { %v277_v35 = vmax.f32 %v274_v34, 0.0  ;;  %v458_v34 = vld [vmem:[#allocation2 + $0x1f0] sm:$0xff] }
 0x128   : > { %494 = vmatpush.msrb.mxu3 %v459_v31  ;;  %v701_v31 = vld [vmem:[#allocation2 + $0x4b0] sm:$0xff] }
 0x129   : > { %874 = vmatmul.msk.f32.gmra.mxu2 %vm291_vm2, %v277_v35  ;;  %v474_v35 = vld [vmem:[#allocation2 + $0x2f0] sm:$0xff] }
 0x12a   : > { %495 = vmatpush.msrb.mxu3 %v458_v34  ;;  %518 = vmatpush.msra.mxu1 %v474_v35  ;;  %v698_v34 = vld [vmem:[#allocation2 + $0x480] sm:$0xff]  ;;  %v697_v35 = vld [vmem:[#allocation2 + $0x470] sm:$0xff] }
 0x12c   : > { %496 = vmatpush.msrb.mxu3 %v457_v36  ;;  %519 = vmatpush.msra.mxu1 %v473_v37  ;;  %v624_v36 = vld [vmem:[#allocation2 + $0x3c0] ss:$0 sm:$0xff] }
 0x1a4   : > { %v315_v41 = vpop.f32.mrf.mxu2 }
 0x1a5   : > { %v1156_v42 = vadd.f32 %v315_v41, %v290_v40  ;;  %v472_v41 = vld [vmem:[#allocation2 + $0x2d0] sm:$0xff] }
 0x1a6   : > { %520 = vmatpush.msra.mxu1 %v472_v41 }
 0x1a7   : > { %875 = vmatmul.msk.f32.vlgmr.msra.gmra.mxu3 %vm207_vm0, %v1156_v42  ;;  %877 = vmatmul.msk.f32.vlgmr.msra.gmra.mxu0 %vm207_vm0, %v1156_v42 }
 0x1ac   : > { %v318_v43 = vpop.f32.mrf.mxu2 }
 0x1ad   : > { %v1162_v44 = vadd.f32 %v318_v43, %v290_v40  ;;  %v456_v40 = vld [vmem:[#allocation2 + $0x1d0] sm:$0xff] }
 0x1ae   : > { %497 = vmatpush.msrb.mxu3 %v456_v40 }
 0x1af   : > { %876 = vmatmul.msk.f32.gmra.mxu3 %vm207_vm0, %v1162_v44  ;;  %878 = vmatmul.msk.f32.gmra.mxu0 %vm207_vm0, %v1162_v44 }
 0x224   : > { %v373_v45 = vpop.f32.mrf.mxu0 }
 0x225   : > { %v380_v47 = vmul.f32 2.0, %v373_v45 }
 0x227   : > { %v389_v53 = vsub.f32 %v385_v48, %v380_v47 }
 0x22a   : > { %v350_v50 = vpop.f32.mrf.mxu3 }
 0x22b   : > { %v379_v51 = vmul.f32 2.0, %v350_v50  ;;  %v471_v50 = vld [vmem:[#allocation2 + $0x2c0] sm:$0xff] }
 0x22c   : > { %v376_v54 = vpop.f32.mrf.mxu0  ;;  %521 = vmatpush.msra.mxu1 %v471_v50  ;;  %v662_v50 = vld [vmem:[#allocation2 + $0x430] ss:$0 sm:$0xff] }
 0x22d   : > { %v388_v52 = vsub.f32 %v384_v49, %v379_v51  ;;  %v382_v56 = vmul.f32 2.0, %v376_v54  ;;  %v454_v51 = vld [vmem:[#allocation2 + $0x1b0] sm:$0xff]  ;;  %v469_v54 = vld [vmem:[#allocation2 + $0x2a0] sm:$0xff] }
 0x22f   : > { %v395_v55 = vmin.f32 %v388_v52, %v389_v53  ;;  %v391_v59 = vsub.f32 %v385_v48, %v382_v56 }
 0x231   : > { %396 = vmin.xlane.f32.xlu0 %v395_v55 }
 0x232   : > { %v353_v57 = vpop.f32.mrf.mxu3 }
 0x233   : > { %v381_v58 = vmul.f32 2.0, %v353_v57 }
 0x235   : > { %v390_v60 = vsub.f32 %v384_v49, %v381_v58  ;;  %v455_v49 = vld [vmem:[#allocation2 + $0x1c0] sm:$0xff] }
 0x236   : > { %498 = vmatpush.msrb.mxu3 %v455_v49 }
 0x237   : > { %v398_v61 = vmin.f32 %v390_v60, %v391_v59 }
 0x238   : > { %499 = vmatpush.msrb.mxu3 %v454_v51 }
 0x239   : > { %399 = vmin.xlane.f32.xlu0 %v398_v61  ;;  %v1061_v61 = vmov 1.0  }
 0x2a4   : > { %v397_v1 = vpop.xlane.xlu0 %396 }
 0x2a5   : > { %vm401_vm3 = vcmp.le.f32.partialorder %v388_v52, %v397_v1  ;;  %vm402_vm4 = vcmp.le.f32.partialorder %v389_v53, %v397_v1  ;;  %v470_v52 = vld [vmem:[#allocation2 + $0x2b0] sm:$0xff]  ;;  %v453_v53 = vld [vmem:[#allocation2 + $0x1a0] sm:$0xff] }
 0x2a6   : > { %v405_v2 = vsel %vm401_vm3, %v1169_v63, 256  ;;  %v406_v3 = vsel %vm402_vm4, %v1172_v0, 256  ;;  %522 = vmatpush.msra.mxu1 %v470_v52  ;;  %500 = vmatpush.msrb.mxu3 %v453_v53  ;;  %vm611_vm3 = vcmask 1040384   ;;  %vm616_vm4 = vcmp.lt.s32.totalorder %v392_v62, 256 }
 0x2a7   : > { %vm409_vm5 = vcmp.lt.s32.totalorder %v405_v2, %v406_v3 }
 0x2a8   : > { %v410_v4 = vsel %vm409_vm5, %v405_v2, %v406_v3  ;;  %523 = vmatpush.msra.mxu1 %v469_v54  ;;  %vm604_vm5 = vcmask 122880  }
 0x2a9   : > { %v412_v5 = vshra.s32 %v410_v4, 16  ;;  %v411_v33 = vand.u32 65535, %v410_v4 }
 0x2ab   : > { %v1176_v6 = vcvt.s32.f32 %v412_v5  ;;  %v413_v39 = vcvt.s32.f32 %v411_v33  ;;  %v532_v5 = vstv %s887_s9  ;;  %v699_v33 = vld [vmem:[#allocation2 + $0x490] sm:$0xff] }
 0x2ac   : > { %v400_v7 = vpop.xlane.xlu0 %399 }
 0x2ad   : > { %vm403_vm6 = vcmp.le.f32.partialorder %v390_v60, %v400_v7  ;;  %vm404_vm7 = vcmp.le.f32.partialorder %v391_v59, %v400_v7  ;;  %415 = vmin.xlane.f32.xlu1 %v1176_v6  ;;  %v623_v7 = vld [vmem:[#allocation2 + $0x3b0] sm:$0xff] }
 0x2ae   : > { %v407_v8 = vsel %vm403_vm6, %v1169_v63, 256  ;;  %v408_v9 = vsel %vm404_vm7, %v1172_v0, 256 }
 0x2af   : > { %vm425_vm8 = vcmp.lt.s32.totalorder %v407_v8, %v408_v9 }
 0x2b0   : > { %v1181_v10 = vsel %vm425_vm8, %v407_v8, %v408_v9  ;;  %v622_v8 = vld [vmem:[#allocation2 + $0x3a0] sm:$0xff]  ;;  %v1062_v9 = vmov 0.0  }
 0x2b1   : > { %v428_v11 = vshra.s32 %v1181_v10, 16  ;;  %v427_v45 = vand.u32 65535, %v1181_v10 }
 0x2b3   : > { %v1184_v12 = vcvt.s32.f32 %v428_v11  ;;  %v429_v47 = vcvt.s32.f32 %v427_v45  ;;  %v661_v11 = vld [vmem:[#allocation2 + $0x420] sm:$0xff] }
 0x2b4   : > { %679 = vmatpush.msra.mxu3 %v661_v11  ;;  %v696_v45 = vld [vmem:[#allocation2 + $0x460] sm:$0xff] }
 0x2b5   : > { %431 = vmin.xlane.f32.xlu1 %v1184_v12 }
 0x2b6   : > { %680 = vmatpush.msra.mxu3 %v660_v20 }
 0x2b8   : > { %681 = vmatpush.msra.mxu3 %v659_v21 }
 0x2ba   : > { %682 = vmatpush.msra.mxu3 %v658_v22 }
 0x2bc   : > { %683 = vmatpush.msra.mxu3 %v657_v25 }
 0x2be   : > { %684 = vmatpush.msra.mxu3 %v656_v26 }
 0x320   : > { %v416_v38 = vpop.xlane.xlu1 %415 }
 0x321   : > { %vm417_vm9 = vcmp.eq.f32.partialorder %v1176_v6, %v416_v38  ;;  %v422_v55 = vcvt.f32.s32 %v416_v38  ;;  %v533_v6 = vadd.s32 %v532_v5, %v1169_v63 }
 0x322   : > { %v418_v43 = vsel %vm417_vm9, %v413_v39, inf }
 0x323   : > { %419 = vmin.xlane.f32.xlu2 %v418_v43  ;;  %v423_v57 = vshll.u32 %v422_v55, 16  ;;  %vm534_vm15 = vcmp.lt.s32.totalorder %v533_v6, 20 }
 0x324   : > { %v888_v10 = vsel %vm534_vm15, 1.0, %v1062_v9 }
 0x328   : > { %v432_v46 = vpop.xlane.xlu1 %431 }
 0x329   : > { %vm433_vm10 = vcmp.eq.f32.partialorder %v1184_v12, %v432_v46  ;;  %v438_v60 = vcvt.f32.s32 %v432_v46  ;;  %v695_v46 = vld [vmem:[#allocation2 + $0x450] sm:$0xff] }
 0x32a   : > { %v434_v48 = vsel %vm433_vm10, %v429_v47, inf  ;;  %v694_v47 = vld [vmem:[#allocation2 + $0x440] sm:$0xff] }
 0x32b   : > { %435 = vmin.xlane.f32.xlu2 %v434_v48  ;;  %v439_v2 = vshll.u32 %v438_v60, 16 }
 0x396   : > { %v420_v56 = vpop.xlane.xlu2 %419 }
 0x397   : > { %v421_v58 = vcvt.f32.s32 %v420_v56 }
 0x399   : > { %v424_v59 = vadd.s32 %v423_v57, %v421_v58 }
 0x39b   : > { %vm442_vm11 = vcmp.eq.s32.totalorder %v1172_v0, %v424_v59  ;;  %vm441_vm12 = vcmp.eq.s32.totalorder %v1169_v63, %v424_v59 }
 0x39c   : > { %883 = vmatmul.msk.f32.vlgmr.msrb.gmra.mxu3 %vm441_vm12, %v1061_v61  ;;  %885 = vmatmul.msk.f32.vlgmr.msra.gmra.mxu1 %vm442_vm11, %v1061_v61 }
 0x39e   : > { %v436_v1 = vpop.xlane.xlu2 %435 }
 0x39f   : > { %v437_v3 = vcvt.f32.s32 %v436_v1 }
 0x3a1   : > { %v440_v4 = vadd.s32 %v439_v2, %v437_v3 }
 0x3a3   : > { %vm443_vm13 = vcmp.eq.s32.totalorder %v1169_v63, %v440_v4  ;;  %vm444_vm14 = vcmp.eq.s32.totalorder %v1172_v0, %v440_v4 }
 0x3a4   : > { %884 = vmatmul.msk.f32.gmra.mxu3 %vm443_vm13, %v1061_v61  ;;  %886 = vmatmul.msk.f32.gmra.mxu1 %vm444_vm14, %v1061_v61 }
 0x3a5   : > { %889 = vmatpush.msk.msrb.mxu0 %vm443_vm13, %v1061_v61  ;;  %892 = vmatpush.msk.msrb.mxu2 %vm444_vm14, %v1061_v61 }
 0x3a7   : > { %890 = vmatpush.msk.msrb.mxu0 %vm441_vm12, %v1061_v61  ;;  %893 = vmatpush.msk.msrb.mxu2 %vm442_vm11, %v1061_v61 }
 0x3a8   : > { %894 = vmatmul.msk.f32.vlgmr.msrb.gmra.mxu2 %vm207_vm0, %v888_v10  ;;  %891 = vmatmul.msk.f32.vlgmr.msrb.gmra.mxu0 %vm207_vm0, %v888_v10 }
 0x3a9   : > { %645 = vmatpush.msra.mxu2 %v623_v7 }
 0x3ab   : > { %646 = vmatpush.msra.mxu2 %v622_v8 }
 0x419   : > { %v525_v12 = vpop.f32.mrf.mxu1 }
 0x41f   : > { %v502_v0 = vpop.f32.mrf.mxu3 }
 0x420   : > { %v526_v13 = vadd.f32 %v525_v12, %v502_v0 }
 0x421   : > { %v528_v14 = vpop.f32.mrf.mxu1 }
 0x422   : > { %896 = vmatmul.msk.f32.vlgmr.msra.gmra.mxu2 %vm207_vm0, %v526_v13  ;;  %v580_v16 = vsub.f32 %v1156_v42, %v526_v13 }
 0x424   : > { %v582_v19 = vmul.f32 %v580_v16, %v580_v16 }
 0x425   : > { %v557_v23 = vpop.f32.mrf.mxu0 }
 0x427   : > { %v505_v63 = vpop.f32.mrf.mxu3 }
 0x428   : > { %v529_v15 = vadd.f32 %v528_v14, %v505_v63 }
 0x42a   : > { %v581_v17 = vsub.f32 %v1162_v44, %v529_v15  ;;  %897 = vmatmul.msk.f32.gmra.mxu2 %vm207_vm0, %v529_v15 }
 0x42b   : > { %v577_v42 = vpop.f32.mrf.mxu2 }
 0x42c   : > { %v583_v18 = vmul.f32 %v581_v17, %v581_v17  ;;  %v610_v44 = vrot.slane %v577_v42, 7 }
 0x42e   : > { %598 = vmatpush.msra.mxu0 %v583_v18  ;;  %v612_v24 = vsel %vm611_vm3, %v557_v23, %v610_v44 }
 0x42f   : > { %618 = vst.msk [vmem:[%s1211_s17] sm:$0x3] %vm616_vm4, %v612_v24 }
 0x430   : > { %599 = vmatpush.msra.mxu0 %v582_v19 }
 0x431   : > { %895 = vmatmul.msk.f32.vlgmr.msra.gmra.mxu0 %vm207_vm0, %v888_v10 }
 0x432   : > { %717 = vmatpush.msrb.mxu0 %v705_v27 }
 0x434   : > { %718 = vmatpush.msrb.mxu0 %v704_v28 }
 0x436   : > { %719 = vmatpush.msrb.mxu0 %v703_v29 }
 0x438   : > { %720 = vmatpush.msrb.mxu0 %v702_v30 }
 0x43a   : > { %721 = vmatpush.msrb.mxu0 %v701_v31 }
 0x43c   : > { %722 = vmatpush.msrb.mxu0 %v700_v32 }
 0x43e   : > { %723 = vmatpush.msrb.mxu0 %v699_v33 }
 0x440   : > { %724 = vmatpush.msrb.mxu0 %v698_v34 }
 0x442   : > { %725 = vmatpush.msrb.mxu0 %v697_v35 }
 0x444   : > { %726 = vmatpush.msrb.mxu0 %v696_v45 }
 0x446   : > { %727 = vmatpush.msrb.mxu0 %v695_v46 }
 0x448   : > { %728 = vmatpush.msrb.mxu0 %v694_v47 }
 0x4a5   : > { %v648_v37 = vpop.f32.mrf.mxu2 }
 0x4a6   : > { %v649_v38 = vadd.f32 %v648_v37, %v624_v36 }
 0x4a8   : > { %v654_v39 = vmax.f32 %v649_v38, 0.0 }
 0x4aa   : > { %898 = vmatmul.msk.f32.vlgmr.msra.gmra.mxu3 %vm246_vm1, %v654_v39 }
 0x4ad   : > { %v651_v40 = vpop.f32.mrf.mxu2 }
 0x4ae   : > { %v652_v41 = vadd.f32 %v651_v40, %v624_v36  ;;  %v601_v48 = vpop.f32.mrf.mxu0 }
 0x4af   : > { %v605_v49 = vsel %vm604_vm5, %v601_v48, 0.0 }
 0x4b0   : > { %v655_v43 = vmax.f32 %v652_v41, 0.0  ;;  %606 = vadd.xlane.f32.xlu0 %v605_v49 }
 0x4b2   : > { %899 = vmatmul.msk.f32.gmra.mxu3 %vm246_vm1, %v655_v43  ;;  %vm619_vm1 = vcmp.lt.s32.totalorder %v392_v62, 128 }
 0x523   : > { %v607_v57 = vpop.xlane.xlu0 %606 }
 0x524   : > { %621 = vst.msk [vmem:[%s1211_s17 + $0x2] sm:$0x1] %vm619_vm1, %v607_v57 }
 0x52d   : > { %v686_v51 = vpop.f32.mrf.mxu3 }
 0x52e   : > { %v687_v52 = vadd.f32 %v686_v51, %v662_v50 }
 0x530   : > { %v692_v53 = vmax.f32 %v687_v52, 0.0 }
 0x532   : > { %900 = vmatmul.msk.f32.vlgmr.msrb.gmra.mxu0 %vm291_vm2, %v692_v53 }
 0x535   : > { %v689_v54 = vpop.f32.mrf.mxu3 }
 0x536   : > { %v690_v55 = vadd.f32 %v689_v54, %v662_v50 }
 0x538   : > { %v693_v56 = vmax.f32 %v690_v55, 0.0 }
 0x53a   : > { %901 = vmatmul.msk.f32.gmra.mxu0 %vm291_vm2, %v693_v56 }
 0x53b   : > { %1017 = shalt.err (!%p1014_p8)
}
 0x53c   : > { %910 = dma.vmem_to_hbm [thread:$0]  (%p1121_p5), %s761_s26, 48, %s763_s27, %s744_s28   ;;  %v706_v62 = vld [vmem:[#allocation2 + $0x500] ss:$0 sm:$0xff] }
 0x53d   : > { %s200_s17 = scalar_lea.vmem %s1263_s2, %s866_s5 }
 0x5af   : > { %v730_v58 = vpop.f32.mrf.mxu0 }
 0x5b0   : > { %v731_v59 = vadd.f32 %v730_v58, %v706_v62 }
 0x5b2   : > { %736 = vst.msk [vmem:[%s200_s17] sm:$0xff] %vm207_vm0, %v731_v59 }
 0x5b7   : > { %v733_v60 = vpop.f32.mrf.mxu0 }
 0x5b8   : > { %v734_v61 = vadd.f32 %v733_v60, %v706_v62 }
 0x5ba   : > { %737 = vst.msk [vmem:[%s200_s17 + $0x8] sm:$0xff] %vm207_vm0, %v734_v61 }
 0x5bb PF: > { %p922_p9 = scmp.ge.s32.totalorder %s1056_s15, 2  ;;  %s782_s22 = sand.u32 1, %s1044_s12  }
 0x5bc   : > { %s783_s4 = scalar_lea.sflag [#allocation4], %s782_s22 }
 0x5bd   : > { %p917_p5 = pnand %p922_p9, %p1125_p6 }
 0x5bf   : > { %p918_p10 = pneg %p917_p5 }
 0x5c1   : > { %1039 = dma.done.wait (%p918_p10), %s783_s4, 48  }
 0x5c2   : > { %1041 = vsyncadd (%p918_p10), %s783_s4, 4294967248  ;;  %p15_p11 = scmp.ge.s32.totalorder %s1108_s18, 4   ;;  %s1267_s12 = smov %s1048_s13 }
 0x5c3   : > { %s1268_s13 = smov %s1052_s14  ;;  %s1269_s14 = smov %s1119_s21 }
 0x5c4   : > { %s1270_s15 = smov %s1108_s18  ;;  %17 = sbr.rel (!%p15_p11) target bundleno = 4 (0x4), region = 81 }
 0x5c9   :  { %789 = vsyncpa [#allocation3], 1 }
 0x5ca   :  { %791 = vsyncpa [#allocation3 + $0x1], 1 }
 0x5cb   :  { %792 = vsyncpa [#allocation4], 1 }
 0x5cc   :  { %794 = vsyncpa [#allocation4 + $0x1], 1 }

</bundles_post_ra>
